<compile_context>
chip_gen: v6e
topology: v6e:2x2x1
jax: 0.10.0
libtpu: 0.0.40
codegen_flags: <defaults>
</compile_context>

<pallas_src>
import jax
import jax.numpy as jnp
from jax.experimental import pallas as pl
from jax.experimental.pallas import tpu as pltpu

LANE = 128


def _laplace_loss_kernel(pred_ref, target_ref, out_ref):
    # Pure streaming elementwise op (HBM-bandwidth bound); compute in f32.
    p = pred_ref[...].astype(jnp.float32)
    t = target_ref[...].astype(jnp.float32)
    out_ref[...] = jnp.abs(1.0 - p / t).astype(out_ref.dtype)


def _round_up(x, m):
    return ((x + m - 1) // m) * m


def laplace_loss(pred, target, reduction="none"):
    assert pred.shape == target.shape, "pred/target must have the same shape"
    assert reduction == "none"  # matches the PyTorch module's behavior
    orig_shape = pred.shape
    dtype = pred.dtype
    # NOTE: division by zero / near-zero target gives inf/NaN, same hazard as
    # the reference PyTorch module.

    n = 1
    for d in orig_shape:
        n *= d

    itemsize = jnp.dtype(dtype).itemsize
    sub = max(8, 32 // itemsize)  # sublane pack: 8 (f32) / 16 (bf16) / 32 (int8)

    # Flatten (free reshape for contiguous arrays). Pad ONLY if the flat length
    # is not a multiple of the 128-lane width; ragged ROW counts are handled by
    # the masked last grid block inside the kernel (no wrapper copy).
    pred_flat = jnp.reshape(pred, (n,))
    targ_flat = jnp.reshape(target, (n,))
    n_lane = _round_up(n, LANE)
    padded = n_lane != n
    if padded:
        pad = n_lane - n
        pred_flat = jnp.concatenate([pred_flat, jnp.zeros((pad,), dtype)])
        targ_flat = jnp.concatenate([targ_flat, jnp.ones((pad,), dtype)])
    rows = n_lane // LANE
    pred2d = pred_flat.reshape(rows, LANE)
    targ2d = targ_flat.reshape(rows, LANE)

    # Block sizing: aim for ~2 MiB per input buffer; keep >= 2 grid steps when
    # there is enough work (v7x megacore), never collapse to tiny tiles.
    if rows <= sub:
        block_rows = rows  # full-extent block (allowed even if < 8 rows)
    else:
        target_block_rows = (2 * 1024 * 1024) // (LANE * itemsize)
        half_rows = _round_up(pl.cdiv(rows, 2), sub)
        block_rows = max(sub, min(target_block_rows, half_rows))
    grid = (pl.cdiv(rows, block_rows),)

    out2d = pl.pallas_call(
        _laplace_loss_kernel,
        out_shape=jax.ShapeDtypeStruct((rows, LANE), dtype),
        grid_spec=pltpu.PrefetchScalarGridSpec(
            num_scalar_prefetch=0,
            grid=grid,
            in_specs=[
                pl.BlockSpec((block_rows, LANE), lambda i: (i, 0)),
                pl.BlockSpec((block_rows, LANE), lambda i: (i, 0)),
            ],
            out_specs=pl.BlockSpec((block_rows, LANE), lambda i: (i, 0)),
        ),
        compiler_params=pltpu.CompilerParams(
            dimension_semantics=("parallel",),
        ),
    )(pred2d, targ2d)

    if padded:
        out = out2d.reshape(-1)[:n].reshape(orig_shape)
    else:
        out = out2d.reshape(orig_shape)
    return out


if __name__ == "__main__":
    key = jax.random.PRNGKey(0)
    k1, k2 = jax.random.split(key)
    # Small NCHW-shaped inputs consistent with a typical use of this loss.
    pred = jax.random.normal(k1, (2, 4, 16, 16), dtype=jnp.float32)
    # keep target away from zero to avoid div-by-zero (same hazard as torch code)
    target = jax.random.normal(k2, (2, 4, 16, 16), dtype=jnp.float32) + 3.0

    out = laplace_loss(pred, target)
    out = jax.block_until_ready(out)

    # reference check in plain JAX
    ref = jnp.abs(1.0 - pred / target)
    assert out.shape == ref.shape
    assert out.dtype == pred.dtype
    assert jnp.allclose(out, ref, rtol=1e-6, atol=1e-6)

    print("KERNEL_OK")
</pallas_src>

<mosaic_0001>
module attributes {stable_mosaic.version = 11 : i64} {
  func.func @_laplace_loss_kernel(%arg0: i32, %arg1: memref<8x128xf32, #tpu.memory_space<vmem>>, %arg2: memref<8x128xf32, #tpu.memory_space<vmem>>, %arg3: memref<8x128xf32, #tpu.memory_space<vmem>>) attributes {dimension_semantics = [#tpu.dimension_semantics<parallel>], iteration_bounds = array<i64: 2>, scalar_prefetch = 0 : i64, scratch_operands = 0 : i64, tpu.core_type = #tpu.core_type<tc>, window_params = [{transform_indices = @transform_0, window_bounds = array<i64: 8, 128>}, {transform_indices = @transform_1, window_bounds = array<i64: 8, 128>}, {transform_indices = @transform_2, window_bounds = array<i64: 8, 128>}]} {
    %c0 = arith.constant 0 : index
    %c0_0 = arith.constant 0 : index
    %0 = vector.load %arg1[%c0, %c0_0] : memref<8x128xf32, #tpu.memory_space<vmem>>, vector<8x128xf32>
    %c0_1 = arith.constant 0 : index
    %c0_2 = arith.constant 0 : index
    %1 = vector.load %arg2[%c0_1, %c0_2] : memref<8x128xf32, #tpu.memory_space<vmem>>, vector<8x128xf32>
    %2 = arith.divf %0, %1 : vector<8x128xf32>
    %cst = arith.constant 1.000000e+00 : f32
    %3 = vector.broadcast %cst : f32 to vector<8x128xf32>
    %4 = arith.subf %3, %2 : vector<8x128xf32>
    %5 = math.absf %4 : vector<8x128xf32>
    %c0_3 = arith.constant 0 : index
    %c0_4 = arith.constant 0 : index
    %6 = vector.load %arg3[%c0_3, %c0_4] : memref<8x128xf32, #tpu.memory_space<vmem>>, vector<8x128xf32>
    tpu.vector_store %arg3[%c0_3, %c0_4], %5 {strides = array<i32>} : memref<8x128xf32, #tpu.memory_space<vmem>>, vector<8x128xf32>,
    return
  }
  func.func @transform_0(%arg0: i32) -> (i32, i32) {
    %c0_i32 = arith.constant 0 : i32
    %c0_i32_0 = arith.constant 0 : i32
    return %arg0, %c0_i32 : i32, i32
  }
  func.func @transform_1(%arg0: i32) -> (i32, i32) {
    %c0_i32 = arith.constant 0 : i32
    %c0_i32_0 = arith.constant 0 : i32
    return %arg0, %c0_i32 : i32, i32
  }
  func.func @transform_2(%arg0: i32) -> (i32, i32) {
    %c0_i32 = arith.constant 0 : i32
    %c0_i32_0 = arith.constant 0 : i32
    return %arg0, %c0_i32 : i32, i32
  }
}

</mosaic_0001>

<bundles_post_ra>
// kernel: tpu_custom_call.1
= control target key start
LH: loop header
LB: loop body
LE: loop exit
PB: predicated region body
PF: predicated region fallthrough
CT: control target
= control target key end

     0   :  { %7 = vsyncpa [#allocation3], 0  ;;  %s716_s0 = inlined_call_operand.hbm [shape: f32[16,128], index: 0, kind: input, shape index: {}]   ;;  %s717_s1 = inlined_call_operand.hbm [shape: f32[16,128], index: 1, kind: input, shape index: {}]   ;;  %s718_s2 = inlined_call_operand.hbm [shape: f32[16,128], index: 2, kind: output, shape index: {}]  }
   0x1   :  { %9 = vsyncpa [#allocation3 + $0x1], 0 }
   0x2   :  { %10 = vsyncpa [#allocation6], 0 }
   0x3   :  { %12 = vsyncpa [#allocation6 + $0x1], 0 }
   0x4   :  { %13 = vsyncpa [#allocation4], 0 }
   0x5   :  { %15 = vsyncpa [#allocation4 + $0x1], 0  ;;  %s522_s9 = smov 0   ;;  %s524_s10 = smov 0  }
   0x6   :  { %s526_s11 = smov 0   ;;  %s528_s12 = smov 0  }
   0x7 LB: > { %s543_s13 = sadd.s32 4294967295, %s502_s12   ;;  %s310_s14 = sadd.s32 4294967294, %s502_s12   ;;  %s502_s12 = sphi %s528_s12, %s737_s12   ;;  %s498_s11 = sphi %s526_s11, %s736_s11   ;;  %s494_s10 = sphi %s524_s10, %s735_s10   ;;  %s490_s9 = sphi %s522_s9, %s734_s9  }
   0x8   : > { %s547_s15 = sadd.s32 1, %s502_s12   ;;  %s28_s16 = sadd.s32 1, %s498_s11 }
   0x9   : > { %s25_s17 = ssub.s32 %s502_s12, %s547_s15  ;;  %p35_p0 = scmp.ne.s32.totalorder %s498_s11, %s494_s10 }
   0xa   : > { %p26_p1 = scmp.eq.s32.totalorder %s25_s17, 0  ;;  %p36_p2 = scmp.eq.s32.totalorder %s502_s12, 0 }
   0xb   : > { %p41_p3 = scmp.ne.s32.totalorder %s494_s10, %s490_s9  ;;  %p42_p4 = scmp.eq.s32.totalorder %s543_s13, 0 }
   0xc   : > { %s559_s18 = scalar_select %p26_p1, %s498_s11, %s28_s16  }
   0xd   : > { %p561_p5 = por %p36_p2, %p35_p0  ;;  %p565_p6 = por %p42_p4, %p41_p3 }
   0xe   : > { %p91_p7 = scmp.eq.s32.totalorder %s543_s13, 1  ;;  %p97_p8 = scmp.eq.s32.totalorder %s310_s14, 1 }
   0xf   : > { %s722_s20 = scalar_select %p565_p6, 1, 0 }
  0x10   : > { %p342_p10 = scmp.lt.s32.totalorder %s502_s12, 2  ;;  %p572_p11 = por %p91_p7, %p35_p0 }
  0x11   : > { %p576_p12 = por %p97_p8, %p41_p3  ;;  %s581_s23 = sand.u32 1, %s498_s11  }
  0x12   : > { %s723_s21 = scalar_select %p572_p11, 1, 0 }
  0x13   : > { %s724_s22 = scalar_select %p576_p12, 1, 0 }
  0x14   : > { %s314_s24 = sshll.u32 %s502_s12, 7  ;;  %s313_s25 = sshll.u32 %s581_s23, 3 }
  0x15   : > { %s590_s28 = scalar_lea.hbm %s716_s0, %s314_s24  ;;  %s121_s29 = scalar_lea.vmem [#allocation2], %s313_s25 }
  0x16   : > { %s128_s30 = sshll.u32 %s121_s29, 4  ;;  %p596_p13 = pnand %p342_p10, %p561_p5  ;;  %s600_s30 = int_to_ptr.vmem [resolvable:$true] %s128_s30 }
  0x17   : > { %s118_s4 = scalar_lea.sflag [#allocation3], %s581_s23  ;;  %s378_s5 = scalar_lea.hbm %s590_s28, 128 }
  0x18   : > { %p379_p2 = scmp.ne.s32.totalorder %s590_s28, %s378_s5  ;;  %p380_p3 = pneg %p596_p13 }
  0x19   : > { %s383_s8 = scalar_lea.hbm %s716_s0, 256  ;;  %p384_p5 = scmp.lt.s32.totalorder %s590_s28, %s716_s0 }
  0x1a   : > { %p381_p4 = pnand %p380_p3, %p379_p2  ;;  %p385_p8 = scmp.lt.s32.totalorder %s383_s8, %s378_s5 }
  0x1c   : > { %p382_p7 = pneg %p381_p4  ;;  %p386_p10 = por %p385_p8, %p384_p5 }
  0x1e   : > { %p387_p9 = pnand %p386_p10, %p382_p7 }
  0x20   : > { %390 = shalt.err (!%p387_p9)
}
  0x21   : > { %s391_s17 = scalar_lea.vmem %s600_s30, 128  ;;  %s504_s19 = smov [#allocation2]  }
  0x22   : > { %p392_p0 = scmp.ne.s32.totalorder %s600_s30, %s391_s17  ;;  %s396_s26 = sshll.u32 %s504_s19, 4  ;;  %s397_s26 = int_to_ptr.vmem [resolvable:$false] %s396_s26 }
  0x23   : > { %s398_s27 = scalar_lea.vmem %s397_s26, 256  ;;  %p399_p1 = scmp.lt.s32.totalorder %s600_s30, %s397_s26 }
  0x24   : > { %p394_p2 = pnand %p392_p0, %p380_p3  ;;  %p400_p12 = scmp.lt.s32.totalorder %s398_s27, %s391_s17 }
  0x26   : > { %p395_p4 = pneg %p394_p2  ;;  %p401_p11 = por %p400_p12, %p399_p1 }
  0x28   : > { %p402_p5 = pnand %p401_p11, %p395_p4 }
  0x2a   : > { %405 = shalt.err (!%p402_p5)
}
  0x2b   : > { %334 = dma.hbm_to_vmem [thread:$0]  (!%p596_p13), %s590_s28, 128, %s600_s30, %s118_s4  }
  0x2c   : > { %p726_p9 = scmp.lt.s32.totalorder %s502_s12, 3  ;;  %p727_p0 = scmp.ge.s32.totalorder %s502_s12, 1 }
  0x2d   : > { %s642_s7 = scalar_lea.hbm %s717_s1, %s314_s24  ;;  %s139_s8 = scalar_lea.vmem [#allocation5], %s313_s25 }
  0x2e   : > { %p633_p7 = pnand %p727_p0, %p726_p9  ;;  %s146_s14 = sshll.u32 %s139_s8, 4  ;;  %s147_s14 = int_to_ptr.vmem [resolvable:$true] %s146_s14 }
  0x2f   : > { %s136_s28 = scalar_lea.sflag [#allocation6], %s581_s23  ;;  %s406_s30 = scalar_lea.hbm %s642_s7, 128 }
  0x30   : > { %s728_s29 = scalar_select %p633_p7, 1, 0 }
  0x31   : > { %p407_p11 = scmp.ne.s32.totalorder %s642_s7, %s406_s30  ;;  %s411_s17 = scalar_lea.hbm %s717_s1, 256 }
  0x32   : > { %p412_p8 = scmp.lt.s32.totalorder %s642_s7, %s717_s1  ;;  %p413_p10 = scmp.lt.s32.totalorder %s411_s17, %s406_s30 }
  0x33   : > { %p409_p12 = pnand %p407_p11, %p380_p3 }
  0x34   : > { %p414_p2 = por %p413_p10, %p412_p8 }
  0x35   : > { %p410_p1 = pneg %p409_p12 }
  0x37   : > { %p415_p4 = pnand %p414_p2, %p410_p1 }
  0x39   : > { %418 = shalt.err (!%p415_p4)
}
  0x3a   : > { %s419_s25 = scalar_lea.vmem %s147_s14, 128  ;;  %s505_s23 = smov [#allocation5]  }
  0x3b   : > { %p420_p5 = scmp.ne.s32.totalorder %s147_s14, %s419_s25  ;;  %s424_s26 = sshll.u32 %s505_s23, 4  ;;  %s425_s26 = int_to_ptr.vmem [resolvable:$false] %s424_s26 }
  0x3c   : > { %s426_s27 = scalar_lea.vmem %s425_s26, 256  ;;  %p427_p11 = scmp.lt.s32.totalorder %s147_s14, %s425_s26 }
  0x3d   : > { %p422_p9 = pnand %p420_p5, %p380_p3  ;;  %p428_p12 = scmp.lt.s32.totalorder %s426_s27, %s419_s25 }
  0x3f   : > { %p423_p0 = pneg %p422_p9  ;;  %p429_p6 = por %p428_p12, %p427_p11 }
  0x41   : > { %p430_p7 = pnand %p429_p6, %p423_p0 }
  0x43   : > { %433 = shalt.err (!%p430_p7)
}
  0x44   : > { %337 = dma.hbm_to_vmem [thread:$0]  (!%p596_p13), %s642_s7, 128, %s147_s14, %s136_s28  }
  0x45   : > { %p729_p1 = scmp.ne.s32.totalorder %s728_s29, 0 }
  0x46   : > { %s668_s5 = sand.u32 (!%p729_p1), 1, %s494_s10   ;;  %p730_p3 = scmp.ne.s32.totalorder (!%p729_p1), %s722_s20, 0 }
  0x47   : > { %155 = sbr.rel (%p729_p1) target bundleno = 113 (0x71), region = 28  ;;  %s318_s6 = sshll.u32 (!%p729_p1), %s668_s5, 3 }
  0x48   : > { %s158_s8 = scalar_lea.sflag (!%p729_p1), [#allocation3], %s668_s5  ;;  %s161_s30 = scalar_lea.vmem (!%p729_p1), [#allocation2], %s318_s6 }
  0x4c   : > { %477 = dma.done.wait (%p730_p3), %s158_s8, 128  }
  0x4d   : > { %479 = vsyncadd (%p730_p3), %s158_s8, 4294967168  ;;  %s167_s3 = scalar_lea.sflag [#allocation6], %s668_s5  ;;  %s170_s7 = scalar_lea.vmem [#allocation5], %s318_s6 }
  0x4e   : > { %481 = dma.done.wait (%p730_p3), %s167_s3, 128  }
  0x4f   : > { %483 = vsyncadd (%p730_p3), %s167_s3, 4294967168  ;;  %v197_v0 = vld [vmem:[%s170_s7] sm:$0xff]  ;;  %v196_v1 = vld [vmem:[%s161_s30] sm:$0xff]  ;;  %s195_s29 = scalar_lea.vmem [#allocation7], %s318_s6  ;;  %s322_s28 = sshll.u32 %s543_s13, 7 }
  0x50   : > { %376 = vrcp.f32 %v197_v0  ;;  %s217_s14 = sshll.u32 %s195_s29, 4  ;;  %s215_s17 = scalar_lea.hbm %s718_s2, %s322_s28  ;;  %s218_s14 = int_to_ptr.vmem [resolvable:$true] %s217_s14 }
  0x51   : > { %s204_s20 = scalar_lea.sflag [#allocation4], %s668_s5  ;;  %s434_s24 = scalar_lea.vmem %s218_s14, 128 }
  0x52   : > { %p435_p6 = scmp.ne.s32.totalorder %s218_s14, %s434_s24  ;;  %p731_p13 = scmp.ne.s32.totalorder %s723_s21, 0 }
  0x53   : > { %s506_s19 = smov [#allocation7]  }
  0x54   : > { %p436_p7 = pnand %p435_p6, %p731_p13  ;;  %s438_s25 = sshll.u32 %s506_s19, 4  ;;  %s439_s25 = int_to_ptr.vmem [resolvable:$false] %s438_s25 }
  0x55   : > { %s440_s23 = scalar_lea.vmem %s439_s25, 256  ;;  %p441_p10 = scmp.lt.s32.totalorder %s218_s14, %s439_s25 }
  0x56   : > { %p437_p8 = pneg %p436_p7  ;;  %p442_p2 = scmp.lt.s32.totalorder %s440_s23, %s434_s24 }
  0x58   : > { %p443_p4 = por %p442_p2, %p441_p10 }
  0x5a   : > { %p444_p5 = pnand %p443_p4, %p437_p8 }
  0x5d   : > { %v377_v2 = vpop.eup %376 }
  0x5e   : > { %v199_v3 = vmul.f32 %v377_v2, %v196_v1 }
  0x60   : > { %v200_v4 = vsub.f32 1.0, %v199_v3 }
  0x62   : > { %v201_v5 = vand.u32 2147483647, %v200_v4 }
  0x64   : > { %202 = vst [vmem:[%s195_s29] sm:$0xff] %v201_v5 }
  0x65   : > { %447 = shalt.err (!%p444_p5)
}
  0x66   : > { %s448_s13 = scalar_lea.hbm %s215_s17, 128  ;;  %s452_s5 = scalar_lea.hbm %s718_s2, 256 }
  0x67   : > { %p449_p9 = scmp.ne.s32.totalorder %s215_s17, %s448_s13  ;;  %p453_p12 = scmp.lt.s32.totalorder %s215_s17, %s718_s2 }
  0x68   : > { %p454_p1 = scmp.lt.s32.totalorder %s452_s5, %s448_s13 }
  0x69   : > { %p450_p0 = pnand %p449_p9, %p731_p13 }
  0x6a   : > { %p455_p3 = por %p454_p1, %p453_p12 }
  0x6b   : > { %p451_p11 = pneg %p450_p0 }
  0x6d   : > { %p456_p6 = pnand %p455_p3, %p451_p11 }
  0x6f   : > { %459 = shalt.err (!%p456_p6)
}
  0x70   : > { %329 = dma.vmem_to_hbm [thread:$0]  (%p731_p13), %s218_s14, 128, %s215_s17, %s204_s20  }
  0x71 PF: > { %s229_s30 = sand.u32 1, %s490_s9   ;;  %p732_p7 = scmp.ne.s32.totalorder %s724_s22, 0 }
  0x72   : > { %p733_p8 = scmp.ge.s32.totalorder %s502_s12, 2  ;;  %s230_s3 = scalar_lea.sflag [#allocation4], %s229_s30 }
  0x74   : > { %p339_p10 = pnand %p733_p8, %p732_p7 }
  0x76   : > { %p340_p2 = pneg %p339_p10 }
  0x78   : > { %485 = dma.done.wait (%p340_p2), %s230_s3, 128  }
  0x79   : > { %487 = vsyncadd (%p340_p2), %s230_s3, 4294967168  ;;  %p18_p4 = scmp.ge.s32.totalorder %s547_s15, 4   ;;  %s734_s9 = smov %s494_s10 }
  0x7a   : > { %s735_s10 = smov %s498_s11  ;;  %s736_s11 = smov %s559_s18 }
  0x7b   : > { %s737_s12 = smov %s547_s15  ;;  %20 = sbr.rel (!%p18_p4) target bundleno = 7 (0x7), region = 86 }
  0x80   :  { %235 = vsyncpa [#allocation3], 1 }
  0x81   :  { %237 = vsyncpa [#allocation3 + $0x1], 1 }
  0x82   :  { %238 = vsyncpa [#allocation6], 1 }
  0x83   :  { %240 = vsyncpa [#allocation6 + $0x1], 1 }
  0x84   :  { %241 = vsyncpa [#allocation4], 1 }
  0x85   :  { %243 = vsyncpa [#allocation4 + $0x1], 1 }

</bundles_post_ra>
